<compile_context>
chip_gen: v7x
topology: tpu7x:2x2x1
jax: 0.10.0
libtpu: 0.0.40
codegen_flags: <defaults>
</compile_context>

<pallas_src>
import jax
import jax.numpy as jnp
from jax import lax
from jax.experimental import pallas as pl
from jax.experimental.pallas import tpu as pltpu

EPS = 1e-5  # nn.LayerNorm default

_TARGET_BLOCK_BYTES = 2 * 1024 * 1024  # ~1-4 MiB streaming sweet spot
_MIN_TOTAL_STEPS = 8                   # >= 2 cores x pipeline depth x a few steps


def _layernorm2d_kernel(x_ref, g_ref, b_ref, o_ref):
    # x_ref / o_ref: (C, T) for the tiled path or (bB, C, HW) for the small-HW
    # batched path; the channel axis is always axis -2.
    # g_ref / b_ref: (C, 1) float32, VMEM-resident (constant index_map).
    x = x_ref[...].astype(jnp.float32)
    c = x.shape[-2]
    inv_c = 1.0 / c

    mean = jnp.sum(x, axis=-2, keepdims=True) * inv_c
    d = x - mean                                            # centered difference
    var = jnp.sum(d * d, axis=-2, keepdims=True) * inv_c    # biased (LayerNorm)
    inv = lax.rsqrt(var + EPS)

    y = d * inv * g_ref[...] + b_ref[...]
    o_ref[...] = y.astype(o_ref.dtype)


def _vmem_budget_bytes():
    """Generation-aware block-sizing budget (headroom under 32 MiB scoped limit;
    tighter on v7x whose physical VMEM is only 64 MiB per TensorCore)."""
    cap = 128 * 1024 * 1024
    try:
        info = pltpu.get_tpu_info()
        cap = int(getattr(info, "vmem_capacity_bytes", cap))
    except Exception:
        pass
    return 14 * 1024 * 1024 if cap <= 64 * 1024 * 1024 else 20 * 1024 * 1024


def _choose_spatial_tile(B, C, HW, itemsize, budget):
    """Lane-dense (multiple-of-128) spatial tile: fits VMEM *including* the fp32
    in-kernel temps, stays near the ~2 MiB streaming sweet spot, and leaves
    enough grid steps for pipelining / dual-core sharding."""
    # Live bytes per spatial column: double-buffered in + out, plus ~2 fp32
    # temporaries (x upcast + centered difference) materialized in the body.
    per_col = max(1, C) * (4 * itemsize + 2 * 4)
    max_cols_vmem = max(128, budget // per_col)
    # Keep each block around the measured streaming sweet spot.
    target_cols = max(128, _TARGET_BLOCK_BYTES // max(1, C * itemsize))
    # Keep B * n_spatial >= ~8 when the spatial extent allows it.
    min_spatial_steps = max(1, -(-_MIN_TOTAL_STEPS // max(1, B)))
    cols_for_steps = max(128, HW // min_spatial_steps)

    tile = min(HW, max_cols_vmem, target_cols, cols_for_steps)
    return max(128, (tile // 128) * 128)


def _choose_batch_block(B, C, HW, itemsize, budget):
    """For HW < 128: how many whole images to pack into one block."""
    per_img = max(1, C * HW) * (4 * itemsize + 2 * 4)
    max_imgs_vmem = max(1, budget // per_img)
    target_imgs = max(1, _TARGET_BLOCK_BYTES // max(1, C * HW * itemsize))
    return int(min(B, max_imgs_vmem, target_imgs))


def layer_norm_2d(x_nchw, gamma, beta):
    """x_nchw: (B, C, H, W); gamma, beta: (C,). Returns (B, C, H, W)."""
    B, C, H, W = x_nchw.shape
    HW = H * W
    itemsize = x_nchw.dtype.itemsize
    budget = _vmem_budget_bytes()
    vmem_limit = 32 * 1024 * 1024  # explicit: v5e's scoped default is only 16 MiB

    # Free reshape: memory layout stays NCHW-contiguous, no HBM transpose.
    x3 = x_nchw.reshape(B, C, HW)
    g2 = gamma.astype(jnp.float32).reshape(C, 1)
    b2 = beta.astype(jnp.float32).reshape(C, 1)

    if HW >= 128:
        tile = _choose_spatial_tile(B, C, HW, itemsize, budget)
        n_spatial = pl.cdiv(HW, tile)
        out3 = pl.pallas_call(
            _layernorm2d_kernel,
            out_shape=jax.ShapeDtypeStruct((B, C, HW), x_nchw.dtype),
            grid_spec=pltpu.PrefetchScalarGridSpec(
                num_scalar_prefetch=0,
                grid=(B, n_spatial),
                in_specs=[
                    # leading batch dim squeezed out of the kernel view
                    pl.BlockSpec((None, C, tile), lambda b, s: (b, 0, s)),
                    pl.BlockSpec((C, 1), lambda b, s: (0, 0)),
                    pl.BlockSpec((C, 1), lambda b, s: (0, 0)),
                ],
                out_specs=pl.BlockSpec((None, C, tile), lambda b, s: (b, 0, s)),
            ),
            compiler_params=pltpu.CompilerParams(
                dimension_semantics=("parallel", "parallel"),
                vmem_limit_bytes=vmem_limit,
            ),
        )(x3, g2, b2)
    else:
        # Small spatial maps: pack several batch images per step to amortize the
        # per-step overhead and the (unavoidable) masked partial-lane stores.
        bB = _choose_batch_block(B, C, HW, itemsize, budget)
        out3 = pl.pallas_call(
            _layernorm2d_kernel,
            out_shape=jax.ShapeDtypeStruct((B, C, HW), x_nchw.dtype),
            grid_spec=pltpu.PrefetchScalarGridSpec(
                num_scalar_prefetch=0,
                grid=(pl.cdiv(B, bB),),
                in_specs=[
                    pl.BlockSpec((bB, C, HW), lambda i: (i, 0, 0)),
                    pl.BlockSpec((C, 1), lambda i: (0, 0)),
                    pl.BlockSpec((C, 1), lambda i: (0, 0)),
                ],
                out_specs=pl.BlockSpec((bB, C, HW), lambda i: (i, 0, 0)),
            ),
            compiler_params=pltpu.CompilerParams(
                dimension_semantics=("parallel",),
                vmem_limit_bytes=vmem_limit,
            ),
        )(x3, g2, b2)

    return out3.reshape(B, C, H, W)


def _reference(x_nchw, gamma, beta):
    x = jnp.transpose(x_nchw, (0, 2, 3, 1)).astype(jnp.float32)
    mean = jnp.mean(x, axis=-1, keepdims=True)
    var = jnp.mean((x - mean) ** 2, axis=-1, keepdims=True)
    y = (x - mean) / jnp.sqrt(var + EPS) * gamma + beta
    return jnp.transpose(y, (0, 3, 1, 2)).astype(x_nchw.dtype)


if __name__ == "__main__":
    key = jax.random.PRNGKey(0)

    # Case 1: lane-dense tiled path (HW = 256 >= 128), nn.LayerNorm defaults.
    B, C, H, W = 2, 4, 16, 16
    k1, k2, k3, k4, k5 = jax.random.split(key, 5)
    x = jax.random.normal(k1, (B, C, H, W), dtype=jnp.float32)
    gamma = jnp.ones((C,), dtype=jnp.float32)
    beta = jnp.zeros((C,), dtype=jnp.float32)

    out = jax.block_until_ready(layer_norm_2d(x, gamma, beta))
    ref = _reference(x, gamma, beta)
    assert out.shape == (B, C, H, W)
    assert jnp.allclose(out, ref, atol=1e-4, rtol=1e-4), float(
        jnp.max(jnp.abs(out - ref))
    )

    # Case 2: small-HW batched path (7x7 = 49 < 128), non-trivial affine.
    B2, C2, H2, W2 = 3, 8, 7, 7
    x2 = jax.random.normal(k2, (B2, C2, H2, W2), dtype=jnp.float32)
    gamma2 = jax.random.normal(k3, (C2,), dtype=jnp.float32)
    beta2 = jax.random.normal(k4, (C2,), dtype=jnp.float32)

    out2 = jax.block_until_ready(layer_norm_2d(x2, gamma2, beta2))
    ref2 = _reference(x2, gamma2, beta2)
    assert out2.shape == (B2, C2, H2, W2)
    assert jnp.allclose(out2, ref2, atol=1e-4, rtol=1e-4), float(
        jnp.max(jnp.abs(out2 - ref2))
    )

    print("KERNEL_OK")
</pallas_src>

<mosaic_0001>
module attributes {stable_mosaic.version = 11 : i64} {
  func.func @_layernorm2d_kernel(%arg0: i32, %arg1: i32, %arg2: memref<1x4x128xf32, #tpu.memory_space<vmem>>, %arg3: memref<4x1xf32, #tpu.memory_space<vmem>>, %arg4: memref<4x1xf32, #tpu.memory_space<vmem>>, %arg5: memref<1x4x128xf32, #tpu.memory_space<vmem>>) attributes {dimension_semantics = [#tpu.dimension_semantics<parallel>, #tpu.dimension_semantics<parallel>], iteration_bounds = array<i64: 2, 2>, scalar_prefetch = 0 : i64, scratch_operands = 0 : i64, tpu.core_type = #tpu.core_type<tc>, window_params = [{transform_indices = @transform_0, window_bounds = array<i64: 1, 4, 128>}, {pipeline_mode = #tpu.pipeline_mode<synchronous>, transform_indices = @transform_1, window_bounds = array<i64: 4, 1>}, {pipeline_mode = #tpu.pipeline_mode<synchronous>, transform_indices = @transform_2, window_bounds = array<i64: 4, 1>}, {transform_indices = @transform_3, window_bounds = array<i64: 1, 4, 128>}]} {
    %c0 = arith.constant 0 : index
    %c0_0 = arith.constant 0 : index
    %c0_1 = arith.constant 0 : index
    %0 = vector.load %arg2[%c0, %c0_0, %c0_1] : memref<1x4x128xf32, #tpu.memory_space<vmem>>, vector<1x4x128xf32>
    %1 = vector.shape_cast %0 : vector<1x4x128xf32> to vector<4x128xf32>
    %cst = arith.constant dense<0.000000e+00> : vector<128xf32>
    %2 = vector.multi_reduction <add>, %1, %cst [0] : vector<4x128xf32> to vector<128xf32>
    %3 = vector.shape_cast %2 : vector<128xf32> to vector<1x128xf32>
    %cst_2 = arith.constant 2.500000e-01 : f32
    %4 = vector.broadcast %cst_2 : f32 to vector<1x128xf32>
    %5 = arith.mulf %3, %4 : vector<1x128xf32>
    %6 = vector.broadcast %5 : vector<1x128xf32> to vector<4x128xf32>
    %7 = arith.subf %1, %6 : vector<4x128xf32>
    %8 = arith.mulf %7, %7 : vector<4x128xf32>
    %cst_3 = arith.constant dense<0.000000e+00> : vector<128xf32>
    %9 = vector.multi_reduction <add>, %8, %cst_3 [0] : vector<4x128xf32> to vector<128xf32>
    %10 = vector.shape_cast %9 : vector<128xf32> to vector<1x128xf32>
    %cst_4 = arith.constant 2.500000e-01 : f32
    %11 = vector.broadcast %cst_4 : f32 to vector<1x128xf32>
    %12 = arith.mulf %10, %11 : vector<1x128xf32>
    %cst_5 = arith.constant 9.99999974E-6 : f32
    %13 = vector.broadcast %cst_5 : f32 to vector<1x128xf32>
    %14 = arith.addf %12, %13 : vector<1x128xf32>
    %15 = math.rsqrt %14 : vector<1x128xf32>
    %16 = vector.broadcast %15 : vector<1x128xf32> to vector<4x128xf32>
    %17 = arith.mulf %7, %16 : vector<4x128xf32>
    %c0_6 = arith.constant 0 : index
    %c0_7 = arith.constant 0 : index
    %18 = vector.load %arg3[%c0_6, %c0_7] : memref<4x1xf32, #tpu.memory_space<vmem>>, vector<4x1xf32>
    %19 = vector.broadcast %18 : vector<4x1xf32> to vector<4x128xf32>
    %20 = arith.mulf %17, %19 : vector<4x128xf32>
    %c0_8 = arith.constant 0 : index
    %c0_9 = arith.constant 0 : index
    %21 = vector.load %arg4[%c0_8, %c0_9] : memref<4x1xf32, #tpu.memory_space<vmem>>, vector<4x1xf32>
    %22 = vector.broadcast %21 : vector<4x1xf32> to vector<4x128xf32>
    %23 = arith.addf %20, %22 : vector<4x128xf32>
    %c0_10 = arith.constant 0 : index
    %c0_11 = arith.constant 0 : index
    %c0_12 = arith.constant 0 : index
    %24 = vector.load %arg5[%c0_10, %c0_11, %c0_12] : memref<1x4x128xf32, #tpu.memory_space<vmem>>, vector<1x4x128xf32>
    %25 = vector.shape_cast %24 : vector<1x4x128xf32> to vector<4x128xf32>
    %26 = vector.shape_cast %23 : vector<4x128xf32> to vector<1x4x128xf32>
    tpu.vector_store %arg5[%c0_10, %c0_11, %c0_12], %26 {strides = array<i32>} : memref<1x4x128xf32, #tpu.memory_space<vmem>>, vector<1x4x128xf32>,
    return
  }
  func.func @transform_0(%arg0: i32, %arg1: i32) -> (i32, i32, i32) {
    %c0_i32 = arith.constant 0 : i32
    %c0_i32_0 = arith.constant 0 : i32
    return %arg0, %c0_i32, %arg1 : i32, i32, i32
  }
  func.func @transform_1(%arg0: i32, %arg1: i32) -> (i32, i32) {
    %c0_i32 = arith.constant 0 : i32
    %c0_i32_0 = arith.constant 0 : i32
    %c0_i32_1 = arith.constant 0 : i32
    return %c0_i32, %c0_i32_0 : i32, i32
  }
  func.func @transform_2(%arg0: i32, %arg1: i32) -> (i32, i32) {
    %c0_i32 = arith.constant 0 : i32
    %c0_i32_0 = arith.constant 0 : i32
    %c0_i32_1 = arith.constant 0 : i32
    return %c0_i32, %c0_i32_0 : i32, i32
  }
  func.func @transform_3(%arg0: i32, %arg1: i32) -> (i32, i32, i32) {
    %c0_i32 = arith.constant 0 : i32
    %c0_i32_0 = arith.constant 0 : i32
    return %arg0, %c0_i32, %arg1 : i32, i32, i32
  }
}

</mosaic_0001>

<bundles_post_ra>
// kernel: tpu_custom_call.1
= control target key start
LH: loop header
LB: loop body
LE: loop exit
PB: predicated region body
PF: predicated region fallthrough
CT: control target
= control target key end

     0   :  { %8 = vsyncpa [#allocation3], 0  ;;  %s797_s0 = inlined_call_operand.hbm [shape: f32[2,4,256], index: 0, kind: input, shape index: {}]   ;;  %s798_s1 = inlined_call_operand.vmem [shape: f32[4,1], index: 1, kind: input, shape index: {}]   ;;  %s799_s2 = inlined_call_operand.vmem [shape: f32[4,1], index: 2, kind: input, shape index: {}]   ;;  %s800_s3 = inlined_call_operand.hbm [shape: f32[2,4,256], index: 3, kind: output, shape index: {}]  }
   0x1   :  { %10 = vsyncpa [#allocation3 + $0x1], 0 }
   0x2   :  { %11 = vsyncpa [#allocation4], 0 }
   0x3   :  { %13 = vsyncpa [#allocation4 + $0x1], 0  ;;  %s593_s12 = smov 0   ;;  %s595_s13 = smov 0  }
   0x4   :  { %s597_s14 = smov 0   ;;  %s599_s15 = smov 0  }
   0x5   :  { %s601_s16 = smov 0   ;;  %s603_s17 = smov 0  }
   0x6   :  { %s605_s18 = smov 0   ;;  %s607_s19 = smov 0  }
   0x7 LB: > { %s343_s20 = sadd.s32 4294967295, %s568_s19   ;;  %s344_s21 = sadd.s32 4294967294, %s568_s19   ;;  %s568_s19 = sphi %s607_s19, %s19_s19   ;;  %s564_s18 = sphi %s605_s18, %s817_s18   ;;  %s560_s17 = sphi %s603_s17, %s816_s17   ;;  %s556_s16 = sphi %s601_s16, %s815_s16   ;;  %s552_s15 = sphi %s599_s15, %s814_s15   ;;  %s548_s14 = sphi %s597_s14, %s813_s14   ;;  %s544_s13 = sphi %s595_s13, %s812_s13   ;;  %s540_s12 = sphi %s593_s12, %s811_s12  }
   0x8   : > { %s28_s22 = sadd.s32 1, %s560_s17  ;;  %s31_s23 = sadd.s32 1, %s564_s18 }
   0x9   : > { %p29_p0 = scmp.ge.s32.totalorder %s28_s22, 2  ;;  %s40_s24 = sadd.s32 1, %s548_s14 }
   0xa   : > { %p47_p1 = scmp.ne.s32.totalorder %s548_s14, %s544_s13  ;;  %p48_p2 = scmp.eq.s32.totalorder %s568_s19, 0 }
   0xb   : > { %s819_s22 = smov (%p29_p0, %s28_s22), 0  ;;  %s821_s23 = smov (!%p29_p0, %s31_s23), %s564_s18 }
   0xc   : > { %s36_s25 = ssub.s32 %s560_s17, %s819_s22  ;;  %p646_p3 = por %p48_p2, %p47_p1 }
   0xd   : > { %p33_p4 = scmp.ge.s32.totalorder %s821_s23, 2  ;;  %p53_p5 = scmp.ne.s32.totalorder %s544_s13, %s540_s12 }
   0xe   : > { %p54_p6 = scmp.eq.s32.totalorder %s343_s20, 0  ;;  %p121_p7 = scmp.eq.s32.totalorder %s343_s20, 3 }
   0xf   : > { %s823_s23 = smov (%p33_p4, %s821_s23), 0  ;;  %p127_p10 = scmp.eq.s32.totalorder %s344_s21, 3 }
  0x10   : > { %p654_p8 = por %p54_p6, %p53_p5  ;;  %p658_p9 = por %p121_p7, %p47_p1 }
  0x11   : > { %s35_s29 = ssub.s32 %s564_s18, %s823_s23  ;;  %p664_p12 = por %p127_p10, %p53_p5 }
  0x12   : > { %s804_s28 = scalar_select %p658_p9, 1, 0 }
  0x13   : > { %s37_s30 = sor.u32 %s36_s25, %s35_s29  ;;  %p370_p13 = scmp.lt.s32.totalorder %s568_s19, 4 }
  0x14   : > { %p38_p11 = scmp.eq.s32.totalorder %s37_s30, 0  ;;  %s153_s5 = sand.u32 1, %s548_s14  }
  0x15   : > { %s805_s4 = scalar_select %p664_p12, 1, 0 }
  0x16   : > { %s671_s6 = scalar_select %p38_p11, %s548_s14, %s40_s24  }
  0x17   : > { %s347_s7 = sshll.u32 %s153_s5, 2  ;;  %s348_s8 = sshll.u32 %s564_s18, 1 }
  0x18   : > { %s162_s9 = sadd.s32 %s560_s17, %s348_s8  ;;  %s157_s10 = scalar_lea.vmem [#allocation2], %s347_s7 }
  0x19   : > { %s166_s11 = sshll.u32 %s157_s10, 4  ;;  %s349_s20 = sshll.u32 %s162_s9, 6  ;;  %s675_s11 = int_to_ptr.vmem [resolvable:$true] %s166_s11 }
  0x1a   : > { %s680_s29 = scalar_lea.hbm %s797_s0, %s349_s20  ;;  %p684_p0 = pnand %p370_p13, %p646_p3 }
  0x1b   : > { %s154_s30 = scalar_lea.sflag [#allocation3], %s153_s5  ;;  %s440_s7 = scalar_lea.hbm %s680_s29, 64 }
  0x1c   : > { %p441_p4 = scmp.ne.s32.totalorder %s680_s29, %s440_s7  ;;  %p442_p5 = pneg %p684_p0 }
  0x1d   : > { %s445_s9 = scalar_lea.hbm %s797_s0, 256  ;;  %p446_p3 = scmp.lt.u32.totalorder %s680_s29, %s797_s0 }
  0x1e   : > { %p443_p6 = pnand %p442_p5, %p441_p4  ;;  %p447_p10 = scmp.lt.u32.totalorder %s445_s9, %s440_s7 }
  0x1f   : > { %p449_p13 = scmp.lt.u32.totalorder %s440_s7, %s680_s29 }
  0x20   : > { %p444_p7 = pneg %p443_p6  ;;  %p448_p11 = por %p447_p10, %p446_p3 }
  0x22   : > { %p450_p1 = por %p449_p13, %p448_p11 }
  0x24   : > { %p451_p2 = pnand %p450_p1, %p444_p7 }
  0x26   : > { %454 = shalt.err (!%p451_p2)
}
  0x27   : > { %s455_s5 = scalar_lea.vmem %s675_s11, 64  ;;  %s570_s21 = smov [#allocation2]  }
  0x28   : > { %p456_p4 = scmp.ne.s32.totalorder %s675_s11, %s455_s5  ;;  %s460_s25 = sshll.u32 %s570_s21, 4  ;;  %s461_s25 = int_to_ptr.vmem [resolvable:$false] %s460_s25 }
  0x29   : > { %s462_s26 = scalar_lea.vmem %s461_s25, 128  ;;  %p463_p9 = scmp.lt.s32.totalorder %s675_s11, %s461_s25 }
  0x2a   : > { %p458_p6 = pnand %p456_p4, %p442_p5  ;;  %p464_p3 = scmp.lt.s32.totalorder %s462_s26, %s455_s5 }
  0x2c   : > { %p459_p12 = pneg %p458_p6  ;;  %p465_p10 = por %p464_p3, %p463_p9 }
  0x2e   : > { %p466_p11 = pnand %p465_p10, %p459_p12 }
  0x30   : > { %469 = shalt.err (!%p466_p11)
}
  0x31   : > { %365 = dma.hbm_to_vmem [thread:$0]  (!%p684_p0), %s680_s29, 64, %s675_s11, %s154_s30  }
  0x32   : > { %p807_p1 = scmp.lt.s32.totalorder %s568_s19, 5  ;;  %p808_p2 = scmp.ge.s32.totalorder %s568_s19, 1 }
  0x34   : > { %p172_p5 = pnand %p808_p2, %p807_p1 }
  0x35   : > { %s720_s7 = sand.u32 (!%p172_p5), 1, %s544_s13  }
  0x36   : > { %175 = sbr.rel (%p172_p5) target bundleno = 212 (0xd4), region = 32  ;;  %s351_s8 = sshll.u32 (!%p172_p5), %s720_s7, 2 }
  0x37   : > { %s178_s9 = scalar_lea.sflag (!%p172_p5), [#allocation3], %s720_s7  ;;  %s181_s24 = scalar_lea.vmem (!%p172_p5), [#allocation2], %s351_s8 }
  0x3d   : > { %531 = dma.done.wait (%p654_p8), %s178_s9, 64  }
  0x3e   : > { %533 = vsyncadd (%p654_p8), %s178_s9, 4294967232  ;;  %v571_v0 = vmov 0   ;;  %v227_v1 = vld [vmem:[%s798_s1] sm:$0xf]  ;;  %vm205_vm0 = vcmask 1043456   ;;  %s354_s27 = sshll.u32 %s556_s16, 1 }
  0x3f   : > { %437 = vset.pattern.permute.xlu0 %v571_v0  ;;  %v234_v2 = vld [vmem:[%s799_s2] sm:$0xf]  ;;  %s254_s20 = sadd.s32 %s552_s15, %s354_s27  ;;  %s203_s21 = scalar_lea.vmem [#allocation5], %s351_s8 }
  0x40   : > { %230 = vperm.xlu0 %437, %v227_v1   ;;  %v204_v3 = vld [vmem:[%s181_s24] sm:$0xf]  ;;  %s355_s5 = sshll.u32 %s254_s20, 6  ;;  %s258_s25 = sshll.u32 %s203_s21, 4  ;;  %s745_s25 = int_to_ptr.vmem [resolvable:$true] %s258_s25 }
  0x41   : > { %v206_v4 = vsel %vm205_vm0, %v204_v3, 0.0  ;;  %s743_s24 = scalar_lea.hbm %s800_s3, %s355_s5  ;;  %s243_s15 = scalar_lea.sflag [#allocation4], %s720_s7 }
  0x42   : > { %v207_v5 = vrot.slane %v206_v4, 4  ;;  %s470_s16 = scalar_lea.vmem %s745_s25, 64  ;;  %p809_p9 = scmp.ne.s32.totalorder %s804_s28, 0 }
  0x43   : > { %p471_p8 = scmp.ne.s32.totalorder %s745_s25, %s470_s16  ;;  %s572_s8 = smov [#allocation5]  }
  0x44   : > { %237 = vperm.xlu0 %437, %v234_v2   ;;  %v208_v6 = vadd.f32 %v207_v5, %v206_v4  ;;  %s474_s11 = sshll.u32 %s572_s8, 4  ;;  %s475_s11 = int_to_ptr.vmem [resolvable:$false] %s474_s11 }
  0x45   : > { %p472_p12 = pnand %p471_p8, %p809_p9  ;;  %s476_s29 = scalar_lea.vmem %s475_s11, 128 }
  0x46   : > { %v209_v7 = vrot.slane %v208_v6, 2  ;;  %p477_p7 = scmp.lt.s32.totalorder %s745_s25, %s475_s11  ;;  %p478_p13 = scmp.lt.s32.totalorder %s476_s29, %s470_s16 }
  0x47   : > { %p473_p0 = pneg %p472_p12 }
  0x48   : > { %v210_v8 = vadd.f32 %v209_v7, %v208_v6  ;;  %p479_p4 = por %p478_p13, %p477_p7 }
  0x4a   : > { %v211_v9 = vrot.slane %v210_v8, 1  ;;  %p480_p6 = pnand %p479_p4, %p473_p0 }
  0x4c   : > { %v212_v10 = vadd.f32 %v211_v9, %v210_v8 }
  0x4e   : > { %v213_v11 = vmul.f32 0.25, %v212_v10 }
  0x50   : > { %v214_v12 = vsub.f32 %v204_v3, %v213_v11 }
  0x52   : > { %v215_v13 = vmul.f32 %v214_v12, %v214_v12 }
  0x54   : > { %v216_v14 = vsel %vm205_vm0, %v215_v13, 0.0 }
  0x55   : > { %v217_v15 = vrot.slane %v216_v14, 4 }
  0x57   : > { %v218_v16 = vadd.f32 %v217_v15, %v216_v14 }
  0x59   : > { %v219_v17 = vrot.slane %v218_v16, 2 }
  0x5b   : > { %v220_v18 = vadd.f32 %v219_v17, %v218_v16 }
  0x5d   : > { %v221_v19 = vrot.slane %v220_v18, 1 }
  0x5f   : > { %v222_v20 = vadd.f32 %v221_v19, %v220_v18 }
  0x61   : > { %v223_v21 = vmul.f32 0.25, %v222_v20 }
  0x63   : > { %v224_v22 = vadd.f32 1e-05, %v223_v21 }
  0x65   : > { %438 = vrsqrt.f32 %v224_v22 }
  0x6f   : > { %v439_v23 = vpop.eup %438 }
  0x70   : > { %v226_v24 = vmul.f32 %v439_v23, %v214_v12 }
  0xbf   : > { %v231_v25 = vpop.permute.xlu0 %230 }
  0xc0   : > { %v233_v26 = vmul.f32 %v231_v25, %v226_v24 }
  0xc3   : > { %v238_v27 = vpop.permute.xlu0 %237 }
  0xc4   : > { %v240_v28 = vadd.f32 %v238_v27, %v233_v26 }
  0xc6   : > { %241 = vst [vmem:[%s203_s21] sm:$0xf] %v240_v28 }
  0xc7   : > { %483 = shalt.err (!%p480_p6)
}
  0xc8   : > { %s484_s7 = scalar_lea.hbm %s743_s24, 64  ;;  %s488_s27 = scalar_lea.hbm %s800_s3, 256 }
  0xc9   : > { %p485_p3 = scmp.ne.s32.totalorder %s743_s24, %s484_s7  ;;  %p489_p1 = scmp.lt.u32.totalorder %s743_s24, %s800_s3 }
  0xca   : > { %p490_p2 = scmp.lt.u32.totalorder %s488_s27, %s484_s7  ;;  %p492_p8 = scmp.lt.u32.totalorder %s484_s7, %s743_s24 }
  0xcb   : > { %p486_p10 = pnand %p485_p3, %p809_p9 }
  0xcc   : > { %p491_p5 = por %p490_p2, %p489_p1 }
  0xcd   : > { %p487_p11 = pneg %p486_p10 }
  0xce   : > { %p493_p12 = por %p492_p8, %p491_p5 }
  0xd0   : > { %p494_p0 = pnand %p493_p12, %p487_p11 }
  0xd2   : > { %497 = shalt.err (!%p494_p0)
}
  0xd3   : > { %360 = dma.vmem_to_hbm [thread:$0]  (%p809_p9), %s745_s25, 64, %s743_s24, %s243_s15  }
  0xd4 PF: > { %p371_p7 = scmp.ge.s32.totalorder %s568_s19, 2  ;;  %s270_s21 = sand.u32 1, %s540_s12  }
  0xd5   : > { %p810_p13 = scmp.ne.s32.totalorder %s805_s4, 0  ;;  %s271_s26 = scalar_lea.sflag [#allocation4], %s270_s21 }
  0xd7   : > { %p367_p4 = pnand %p371_p7, %p810_p13 }
  0xd9   : > { %535 = dma.done.wait (!%p367_p4), %s271_s26, 64  }
  0xda   : > { %537 = vsyncadd (!%p367_p4), %s271_s26, 4294967232  ;;  %s19_s19 = sadd.s32 1, %s568_s19   ;;  %s811_s12 = smov %s544_s13 }
  0xdb   : > { %p16_p6 = scmp.ge.s32.totalorder %s19_s19, 6   ;;  %s812_s13 = smov %s548_s14 }
  0xdc   : > { %s813_s14 = smov %s671_s6  ;;  %s814_s15 = smov %s560_s17 }
  0xdd   : > { %s815_s16 = smov %s564_s18  ;;  %s816_s17 = smov %s819_s22 }
  0xde   : > { %s817_s18 = smov %s823_s23  ;;  %18 = sbr.rel (!%p16_p6) target bundleno = 7 (0x7), region = 77 }
  0xe5   :  { %276 = vsyncpa [#allocation3], 1 }
  0xe6   :  { %278 = vsyncpa [#allocation3 + $0x1], 1 }
  0xe7   :  { %279 = vsyncpa [#allocation4], 1 }
  0xe8   :  { %281 = vsyncpa [#allocation4 + $0x1], 1 }

</bundles_post_ra>
